<compile_context>
chip_gen: v5e
topology: v5e:2x2
jax: 0.10.0
libtpu: 0.0.40
codegen_flags: <defaults>
</compile_context>

<pallas_src>
import functools

import jax
import jax.numpy as jnp
from jax.experimental import pallas as pl
from jax.experimental.pallas import tpu as pltpu


def _rmsnorm_kernel(x_ref, w_ref, o_ref, *, eps):
    # x_ref: (tm, D) tile of rows; w_ref: (1, D) learnable scale (resident).
    x = x_ref[...].astype(jnp.float32)
    ms = jnp.mean(x * x, axis=-1, keepdims=True)   # per-row mean of squares
    inv = jax.lax.rsqrt(ms + eps)                   # EUP rsqrt, f32
    w = w_ref[...].astype(jnp.float32)
    o_ref[...] = (x * inv * w).astype(o_ref.dtype)


def _round_up(x, m):
    return ((x + m - 1) // m) * m


def _tpu_config():
    """Best-effort hardware query; falls back to conservative defaults."""
    phys_vmem = 64 * 1024 * 1024  # conservative: v7x per-TC physical VMEM
    tc_count = 1                  # conservative: v5e/v6e single TensorCore
    try:
        info = pltpu.get_tpu_info()
        phys_vmem = int(info.vmem_capacity_bytes)
    except Exception:
        pass
    try:
        kind = jax.devices()[0].device_kind.lower()
        if "v7" in kind:
            tc_count = 2          # only v7x shards the parallel grid over 2 TCs
    except Exception:
        pass
    return phys_vmem, tc_count


def _select_tiling(N, D, dtype):
    """Pick (row_tile, vmem_limit_bytes).

    - Row tile is a multiple of the sublane packing factor (8 f32 / 16 bf16 /
      32 int8) and sized so 2x input + 2x output pipelined buffers use ~75% of
      the requested scoped-VMEM limit (leaving headroom for the weight block
      and compiler scratch).
    - vmem_limit: half of physical VMEM, capped at 64 MiB -> 32 MiB on v7x
      (64 MiB physical), 64 MiB on v5e/v6e (128 MiB physical).  Passed
      explicitly so bigger-than-default tiles don't hit the scoped limit.
    - Grid steps are balanced (near-equal tiles, no tiny trailing tile) and,
      on 2-TC chips, rounded to a multiple of the core count so both cores
      get equal bytes.  Single-TC chips never split a fits-in-one-tile input.
    """
    itemsize = jnp.dtype(dtype).itemsize
    sub = {4: 8, 2: 16, 1: 32}.get(itemsize, 8)

    phys_vmem, tc_count = _tpu_config()
    vmem_limit = min(phys_vmem // 2, 64 * 1024 * 1024)
    buffer_budget = (vmem_limit * 3) // 4           # 2x in + 2x out buffers

    bytes_per_row = 4 * D * itemsize                # across the 4 buffers
    tm_max = max(sub, ((buffer_budget // bytes_per_row) // sub) * sub)

    steps = pl.cdiv(N, tm_max)
    if tc_count > 1:
        if steps > 1:
            steps = _round_up(steps, tc_count)      # balance bytes per core
        elif N >= 512 and N >= 2 * sub:
            steps = tc_count                        # shard mid-size N over 2 TCs
    # Near-equal tiles (avoids a near-empty trailing grid step on serial grids).
    tm = max(sub, _round_up(pl.cdiv(N, steps), sub))
    return tm, vmem_limit


def rmsnorm_pallas(x, weight):
    """x: (..., D); weight: (D,). Returns RMSNorm(x) * weight, same shape/dtype."""
    orig_shape = x.shape
    D = orig_shape[-1]
    x2d = x.reshape(-1, D)
    N = x2d.shape[0]
    w2d = weight.reshape(1, D)

    # torch.nn.RMSNorm(eps=None) uses torch.finfo(x.dtype).eps.
    eps = float(jnp.finfo(x.dtype).eps)

    tm, vmem_limit = _select_tiling(N, D, x.dtype)
    grid = (pl.cdiv(N, tm),)  # partial last tile handled by masked load/store

    itemsize = jnp.dtype(x.dtype).itemsize
    cost = pl.CostEstimate(
        flops=4 * N * D,               # square, mean, scale by inv, scale by w
        transcendentals=N,             # one rsqrt per row
        bytes_accessed=2 * N * D * itemsize + D * itemsize,
    )

    out = pl.pallas_call(
        functools.partial(_rmsnorm_kernel, eps=eps),
        out_shape=jax.ShapeDtypeStruct((N, D), x.dtype),
        grid_spec=pltpu.PrefetchScalarGridSpec(
            num_scalar_prefetch=0,
            grid=grid,
            in_specs=[
                pl.BlockSpec((tm, D), lambda i: (i, 0)),   # large row tile of x
                pl.BlockSpec((1, D), lambda i: (0, 0)),    # resident weight block
            ],
            out_specs=pl.BlockSpec((tm, D), lambda i: (i, 0)),  # lane-dense output
        ),
        compiler_params=pltpu.CompilerParams(
            dimension_semantics=("parallel",),
            vmem_limit_bytes=vmem_limit,
        ),
        cost_estimate=cost,
    )(x2d, w2d)
    return out.reshape(orig_shape)


def rmsnorm_ref(x, weight):
    eps = float(jnp.finfo(x.dtype).eps)
    xf = x.astype(jnp.float32)
    ms = jnp.mean(xf * xf, axis=-1, keepdims=True)
    return (xf * jax.lax.rsqrt(ms + eps) * weight.astype(jnp.float32)).astype(x.dtype)


if __name__ == "__main__":
    # Small shapes consistent with the module's forward: (batch, seq, embeddings_dims)
    batch, seq, embed = 2, 8, 384
    key = jax.random.PRNGKey(0)
    kx, kw, kx2, kx3 = jax.random.split(key, 4)

    x = jax.random.normal(kx, (batch, seq, embed), dtype=jnp.float32)
    # nn.RMSNorm initializes weight to ones; perturb deterministically so the
    # elementwise-affine path is actually exercised.
    weight = jnp.ones((embed,), dtype=jnp.float32) + 0.1 * jax.random.normal(
        kw, (embed,), dtype=jnp.float32
    )

    y = rmsnorm_pallas(x, weight)
    y = jax.block_until_ready(y)
    y_ref = rmsnorm_ref(x, weight)
    assert y.shape == x.shape and y.dtype == x.dtype
    assert jnp.allclose(y, y_ref, atol=1e-5, rtol=1e-5), "mismatch vs reference"

    # Exercise the masked partial-tile path (row count not a multiple of the tile).
    x_odd = jax.random.normal(kx2, (3, 7, embed), dtype=jnp.float32)
    y_odd = jax.block_until_ready(rmsnorm_pallas(x_odd, weight))
    assert jnp.allclose(y_odd, rmsnorm_ref(x_odd, weight), atol=1e-5, rtol=1e-5), (
        "mismatch vs reference (partial tile)"
    )

    # Mid-size input: exercises the multi-core / balanced-tile selection path.
    x_mid = jax.random.normal(kx3, (4, 129, embed), dtype=jnp.float32)
    y_mid = jax.block_until_ready(rmsnorm_pallas(x_mid, weight))
    assert jnp.allclose(y_mid, rmsnorm_ref(x_mid, weight), atol=1e-5, rtol=1e-5), (
        "mismatch vs reference (mid-size)"
    )

    print("KERNEL_OK")
</pallas_src>

<mosaic_0001>
module attributes {stable_mosaic.version = 11 : i64} {
  func.func @_rmsnorm_kernel(%arg0: i32, %arg1: memref<16x384xf32, #tpu.memory_space<vmem>>, %arg2: memref<1x384xf32, #tpu.memory_space<vmem>>, %arg3: memref<16x384xf32, #tpu.memory_space<vmem>>) attributes {dimension_semantics = [#tpu.dimension_semantics<parallel>], iteration_bounds = array<i64: 1>, scalar_prefetch = 0 : i64, scratch_operands = 0 : i64, tpu.core_type = #tpu.core_type<tc>, window_params = [{transform_indices = @transform_0, window_bounds = array<i64: 16, 384>}, {pipeline_mode = #tpu.pipeline_mode<synchronous>, transform_indices = @transform_1, window_bounds = array<i64: 1, 384>}, {transform_indices = @transform_2, window_bounds = array<i64: 16, 384>}]} {
    %c0 = arith.constant 0 : index
    %c0_0 = arith.constant 0 : index
    %0 = vector.load %arg1[%c0, %c0_0] : memref<16x384xf32, #tpu.memory_space<vmem>>, vector<16x384xf32>
    %1 = arith.mulf %0, %0 : vector<16x384xf32>
    %cst = arith.constant dense<0.000000e+00> : vector<16xf32>
    %2 = vector.multi_reduction <add>, %1, %cst [1] : vector<16x384xf32> to vector<16xf32>
    %3 = vector.shape_cast %2 : vector<16xf32> to vector<16x1xf32>
    %cst_1 = arith.constant 3.840000e+02 : f32
    %4 = vector.broadcast %cst_1 : f32 to vector<16x1xf32>
    %5 = arith.divf %3, %4 : vector<16x1xf32>
    %cst_2 = arith.constant 1.1920929E-7 : f32
    %6 = vector.broadcast %cst_2 : f32 to vector<16x1xf32>
    %7 = arith.addf %5, %6 : vector<16x1xf32>
    %8 = math.rsqrt %7 : vector<16x1xf32>
    %c0_3 = arith.constant 0 : index
    %c0_4 = arith.constant 0 : index
    %9 = vector.load %arg2[%c0_3, %c0_4] : memref<1x384xf32, #tpu.memory_space<vmem>>, vector<1x384xf32>
    %10 = vector.broadcast %8 : vector<16x1xf32> to vector<16x384xf32>
    %11 = arith.mulf %0, %10 : vector<16x384xf32>
    %12 = vector.broadcast %9 : vector<1x384xf32> to vector<16x384xf32>
    %13 = arith.mulf %11, %12 : vector<16x384xf32>
    %c0_5 = arith.constant 0 : index
    %c0_6 = arith.constant 0 : index
    %14 = vector.load %arg3[%c0_5, %c0_6] : memref<16x384xf32, #tpu.memory_space<vmem>>, vector<16x384xf32>
    tpu.vector_store %arg3[%c0_5, %c0_6], %13 {strides = array<i32>} : memref<16x384xf32, #tpu.memory_space<vmem>>, vector<16x384xf32>,
    return
  }
  func.func @transform_0(%arg0: i32) -> (i32, i32) {
    %c0_i32 = arith.constant 0 : i32
    %c0_i32_0 = arith.constant 0 : i32
    return %arg0, %c0_i32 : i32, i32
  }
  func.func @transform_1(%arg0: i32) -> (i32, i32) {
    %c0_i32 = arith.constant 0 : i32
    %c0_i32_0 = arith.constant 0 : i32
    %c0_i32_1 = arith.constant 0 : i32
    return %c0_i32, %c0_i32_0 : i32, i32
  }
  func.func @transform_2(%arg0: i32) -> (i32, i32) {
    %c0_i32 = arith.constant 0 : i32
    %c0_i32_0 = arith.constant 0 : i32
    return %arg0, %c0_i32 : i32, i32
  }
}

</mosaic_0001>

<bundles_post_ra>
// kernel: tpu_custom_call.1
= control target key start
LH: loop header
LB: loop body
LE: loop exit
PB: predicated region body
PF: predicated region fallthrough
CT: control target
= control target key end

     0   :  { %7 = vsyncpa [#allocation3], 0  ;;  %s270_s0 = inlined_call_operand.hbm [shape: f32[16,384], index: 0, kind: input, shape index: {}]   ;;  %s271_s1 = inlined_call_operand.hbm [shape: f32[1,384], index: 1, kind: input, shape index: {}]   ;;  %s272_s2 = inlined_call_operand.hbm [shape: f32[16,384], index: 2, kind: output, shape index: {}]  }
   0x1   :  { %8 = vsyncpa [#allocation6], 0 }
   0x2   :  { %9 = vsyncpa [#allocation4], 0  ;;  %s14_s11 = sshll.u32 %s270_s0, 4  ;;  %s229_s12 = smov [#allocation2]   ;;  %s15_s11 = int_to_ptr.hbm [resolvable:$true] %s14_s11 }
   0x3   :  { %s16_s13 = sshll.u32 %s229_s12, 4  ;;  %s28_s16 = sshll.u32 %s271_s1, 4  ;;  %s17_s13 = int_to_ptr.vmem [resolvable:$true] %s16_s13  ;;  %s29_s16 = int_to_ptr.hbm [resolvable:$true] %s28_s16 }
   0x4   :  { %s230_s17 = smov 384   ;;  %s231_s18 = smov 24  }
   0x5   :  { %22 = dma.hbm_to_vmem [thread:$0]  %s15_s11, 768, %s17_s13, [#allocation3], %s230_s17, %s230_s17, %s231_s18  }
   0x6   :  { %s232_s19 = smov [#allocation5]  }
   0x7   :  { %s30_s20 = sshll.u32 %s232_s19, 4  ;;  %s31_s20 = int_to_ptr.vmem [resolvable:$true] %s30_s20 }
   0x8   :  { %33 = dma.hbm_to_vmem [thread:$0]  %s29_s16, 48, %s31_s20, [#allocation6]  }
   0x9   :  { %223 = dma.done.wait [#allocation3], 768  }
   0xa   :  { %224 = vsyncadd [#allocation3], 4294966528 }
   0xb   :  { %225 = dma.done.wait [#allocation6], 48  }
   0xc   :  { %226 = vsyncadd [#allocation6], 4294967248  ;;  %v42_v0 = vld [vmem:[#allocation2] sm:$0xff]  ;;  %v43_v1 = vld [vmem:[#allocation2 + $0x8] sm:$0xff]  ;;  %v233_v16 = vmov 384.0   ;;  %s234_s0 = smov [#allocation7]  }
   0xd   :  { %v44_v2 = vld [vmem:[#allocation2 + $0x10] sm:$0xff]  ;;  %v48_v3 = vmul.f32 %v42_v0, %v42_v0  ;;  %v49_v4 = vmul.f32 %v43_v1, %v43_v1  ;;  %v259_v6 = vld [vmem:[#allocation2 + $0x18] sm:$0xff]  ;;  %v46_v7 = vld [vmem:[#allocation2 + $0x20] sm:$0xff]  ;;  %145 = vrcp.f32 %v233_v16  ;;  %s123_s1 = sshll.u32 %s234_s0, 4  ;;  %s125_s23 = sshll.u32 %s272_s2, 4  ;;  %s124_s1 = int_to_ptr.vmem [resolvable:$true] %s123_s1  ;;  %s126_s23 = int_to_ptr.hbm [resolvable:$true] %s125_s23 }
   0xe   :  { %v50_v5 = vmul.f32 %v44_v2, %v44_v2  ;;  %v51_v9 = vmul.f32 %v259_v6, %v259_v6  ;;  %v52_v10 = vmul.f32 %v46_v7, %v46_v7  ;;  %v47_v11 = vld [vmem:[#allocation2 + $0x28] sm:$0xff]  ;;  %v93_v33 = vld [vmem:[#allocation5] sm:$0x7] }
   0xf   :  { %v54_v8 = vadd.f32 %v49_v4, %v48_v3  ;;  %v53_v13 = vmul.f32 %v47_v11, %v47_v11  ;;  %v101_v38 = vperm.slane %v93_v33, 0  ;;  %v102_v39 = vperm.slane %v93_v33, 1 }
  0x10   :  { %v58_v14 = vadd.f32 %v52_v10, %v51_v9  ;;  %v103_v40 = vperm.slane %v93_v33, 2 }
  0x11   :  { %v55_v12 = vadd.f32 %v54_v8, %v50_v5 }
  0x12   :  { %v59_v15 = vadd.f32 %v58_v14, %v53_v13 }
  0x13   :  { %56 = vadd.xlane.f32.xlu0 %v55_v12  ;;  %v146_v17 = vpop.eup %145 }
  0x14   :  { %v63_v18 = vmul.f32 384.0, %v146_v17  ;;  %vm67_vm0 = vweird.f32 %v146_v17 }
  0x16   :  { %v64_v19 = vsub.f32 1.0, %v63_v18 }
  0x18   :  { %v65_v20 = vmul.f32 %v146_v17, %v64_v19 }
  0x1a   :  { %v66_v21 = vadd.f32 %v146_v17, %v65_v20 }
  0x1b   :  { %60 = vadd.xlane.f32.xlu0 %v59_v15 }
  0x1c   :  { %v68_v22 = vsel %vm67_vm0, %v146_v17, %v66_v21 }
  0x86   :  { %v57_v23 = vpop.xlane.xlu0 %56 }
  0x87   :  { %v69_v24 = vmul.f32 %v68_v22, %v57_v23 }
  0x89   :  { %v71_v25 = vadd.f32 1.1920929e-07, %v69_v24 }
  0x8b   :  { %147 = vrsqrt.f32 %v71_v25  ;;  %vm79_vm2 = vweird.f32 %v71_v25 }
  0x8e   :  { %v61_v26 = vpop.xlane.xlu0 %60 }
  0x8f   :  { %v70_v27 = vmul.f32 %v68_v22, %v61_v26 }
  0x91   :  { %v148_v28 = vpop.eup %147  ;;  %v72_v29 = vadd.f32 1.1920929e-07, %v70_v27 }
  0x92   :  { %v74_v30 = vmul.f32 %v148_v28, %v71_v25  ;;  %vm80_vm1 = vweird.f32 %v148_v28 }
  0x93   :  { %149 = vrsqrt.f32 %v72_v29  ;;  %vm81_vm3 = vmor %vm79_vm2, %vm80_vm1  ;;  %vm89_vm5 = vweird.f32 %v72_v29 }
  0x94   :  { %v75_v31 = vmul.f32 %v148_v28, %v74_v30 }
  0x96   :  { %v76_v32 = vmul.f32 0.5, %v75_v31 }
  0x98   :  { %v77_v34 = vsub.f32 1.5, %v76_v32 }
  0x99   :  { %v150_v35 = vpop.eup %149 }
  0x9a   :  { %v78_v36 = vmul.f32 %v148_v28, %v77_v34  ;;  %v84_v37 = vmul.f32 %v150_v35, %v72_v29  ;;  %vm90_vm4 = vweird.f32 %v150_v35 }
  0x9b   :  { %vm91_vm6 = vmor %vm89_vm5, %vm90_vm4 }
  0x9c   :  { %v82_v41 = vsel %vm81_vm3, %v148_v28, %v78_v36  ;;  %v85_v42 = vmul.f32 %v150_v35, %v84_v37 }
  0x9d   :  { %v94_v43 = vmul.f32 %v82_v41, %v42_v0  ;;  %v95_v44 = vmul.f32 %v82_v41, %v43_v1  ;;  %v96_v45 = vmul.f32 %v82_v41, %v44_v2 }
  0x9e   :  { %v86_v46 = vmul.f32 0.5, %v85_v42 }
  0x9f   :  { %v107_v47 = vmul.f32 %v101_v38, %v94_v43  ;;  %v108_v48 = vmul.f32 %v102_v39, %v95_v44  ;;  %v109_v49 = vmul.f32 %v103_v40, %v96_v45 }
  0xa0   :  { %v87_v50 = vsub.f32 1.5, %v86_v46 }
  0xa1   :  { %113 = vst [vmem:[#allocation7] sm:$0xff] %v107_v47 }
  0xa2   :  { %114 = vst [vmem:[#allocation7 + $0x8] sm:$0xff] %v108_v48  ;;  %v88_v51 = vmul.f32 %v150_v35, %v87_v50 }
  0xa3   :  { %115 = vst [vmem:[#allocation7 + $0x10] sm:$0xff] %v109_v49 }
  0xa4   :  { %v92_v52 = vsel %vm91_vm6, %v150_v35, %v88_v51 }
  0xa5   :  { %v97_v53 = vmul.f32 %v92_v52, %v259_v6  ;;  %v98_v54 = vmul.f32 %v92_v52, %v46_v7  ;;  %v99_v55 = vmul.f32 %v92_v52, %v47_v11 }
  0xa7   :  { %v110_v56 = vmul.f32 %v101_v38, %v97_v53  ;;  %v111_v57 = vmul.f32 %v102_v39, %v98_v54  ;;  %v112_v58 = vmul.f32 %v103_v40, %v99_v55 }
  0xa9   :  { %116 = vst [vmem:[#allocation7 + $0x18] sm:$0xff] %v110_v56 }
  0xaa   :  { %117 = vst [vmem:[#allocation7 + $0x20] sm:$0xff] %v111_v57 }
  0xab   :  { %118 = vst [vmem:[#allocation7 + $0x28] sm:$0xff] %v112_v58 }
  0xac   :  { %131 = dma.vmem_to_hbm [thread:$0]  %s124_s1, 768, %s126_s23, [#allocation4], %s230_s17, %s230_s17, %s231_s18  }
  0xad   :  { %227 = dma.done.wait [#allocation4], 768  }
  0xae   :  { %228 = vsyncadd [#allocation4], 4294966528 }
  0xaf   :  { %136 = vsyncpa [#allocation3], 1 }
  0xb0   :  { %137 = vsyncpa [#allocation6], 1 }
  0xb1   :  { %138 = vsyncpa [#allocation4], 1 }

</bundles_post_ra>
